<compile_context>
chip_gen: v7x
topology: tpu7x:2x2x1
jax: 0.10.0
libtpu: 0.0.40
codegen_flags: <defaults>
</compile_context>

<pallas_src>
import jax
import jax.numpy as jnp
from jax.experimental import pallas as pl
from jax.experimental.pallas import tpu as pltpu


def _round_up(x, m):
    return (x + m - 1) // m * m


# ----------------------------------------------------------------------------
# Kernel
# ----------------------------------------------------------------------------
def _make_kernel(obs_pad, hidden, num_options):
    H = hidden
    n = num_options
    h_pad = _round_up(H, 8)

    def kernel(obs_ref, opt_ref, w_ref, b_ref, out_ref):
        obs = obs_ref[...]                                        # (tb, obs_pad)

        # --- carve the packed slabs with static slices (no extra DMAs) ---
        w1 = w_ref[0:obs_pad, 0:H]                                # (obs_pad, H)
        w2 = w_ref[obs_pad:obs_pad + H, 0:H]                      # (H, H)
        wh = w_ref[obs_pad + h_pad:obs_pad + h_pad + H, 0:3 * n]  # (H, 3n) fused heads
        b1 = b_ref[0:1, 0:H]
        b2 = b_ref[1:2, 0:H]
        bh = b_ref[2:3, 0:3 * n]

        # --- MLPBase trunk: two tanh layers (MXU matmuls + EUP tanh) ---
        h = jnp.tanh(jnp.dot(obs, w1, preferred_element_type=jnp.float32) + b1)
        h = jnp.tanh(jnp.dot(h, w2, preferred_element_type=jnp.float32) + b2)

        # --- fused heads: [ Q | pi logits | old-pi logits ] in ONE matmul ---
        heads = jnp.dot(h, wh, preferred_element_type=jnp.float32) + bh
        q = heads[:, 0:n]
        logits_pi = heads[:, n:2 * n]
        logits_po = heads[:, 2 * n:3 * n]

        def softmax(z):
            m = jnp.max(z, axis=-1, keepdims=True)
            e = jnp.exp(z - m)
            s = jnp.sum(e, axis=-1, keepdims=True)
            return e * pl.reciprocal(s, approx=True)   # EUP reciprocal

        pi = softmax(logits_pi)
        pi_old = softmax(logits_po)

        bt = q.shape[0]
        onehot = (jax.lax.broadcasted_iota(jnp.int32, (bt, n), 1)
                  == opt_ref[...]).astype(jnp.float32)

        # adv     = Q(s,opt) - V_pi(s)     = sum_o q_o * (onehot_o - pi_o)
        # adv_old = Q(s,opt) - V_pi_old(s) = sum_o q_o * (onehot_o - pi_old_o)
        adv_cur = jnp.sum(q * (onehot - pi), axis=-1, keepdims=True)      # (bt,1)
        adv_old = jnp.sum(q * (onehot - pi_old), axis=-1, keepdims=True)  # (bt,1)

        # Lane-packed output: col0=terminal_adv, col1=option_adv, col2=option_adv_old.
        # TODO(synk): PPOC-style deliberation cost for the termination advantage is
        # not reproducible from the given source and is omitted (terminal == option adv).
        lane = jax.lax.broadcasted_iota(jnp.int32, (bt, 3), 1)
        out_ref[...] = jnp.where(lane == 2, adv_old, adv_cur)

    return kernel


# ----------------------------------------------------------------------------
# Parameter init & packing
# ----------------------------------------------------------------------------
def init_r_critic_params(key, obs_dim, hidden, num_options):
    """Orthogonal-ish init mirroring use_orthogonal=True, bias=0.

    The frozen 'old' option-policy head starts as a copy of the current pi head.
    """
    ks = jax.random.split(key, 4)
    ortho = jax.nn.initializers.orthogonal()
    w_pi = ortho(ks[3], (hidden, num_options), jnp.float32)
    return {
        "w1": ortho(ks[0], (obs_dim, hidden), jnp.float32),
        "b1": jnp.zeros((hidden,), jnp.float32),
        "w2": ortho(ks[1], (hidden, hidden), jnp.float32),
        "b2": jnp.zeros((hidden,), jnp.float32),
        "wq": ortho(ks[2], (hidden, num_options), jnp.float32),
        "bq": jnp.zeros((num_options,), jnp.float32),
        "wpi": w_pi,
        "bpi": jnp.zeros((num_options,), jnp.float32),
        "wpo": w_pi,                                   # frozen copy of pi head
        "bpo": jnp.zeros((num_options,), jnp.float32),
    }


def pack_r_critic_params(params, obs_dim, hidden, num_options):
    """Pack all weights into one (rows, W) slab and all biases into one (3, W) slab."""
    obs_pad = _round_up(obs_dim, 8)
    h_pad = _round_up(hidden, 8)
    n3 = 3 * num_options
    W = max(hidden, n3)
    rows = obs_pad + 2 * h_pad

    w_slab = jnp.zeros((rows, W), jnp.float32)
    w_slab = w_slab.at[0:obs_dim, 0:hidden].set(params["w1"])
    w_slab = w_slab.at[obs_pad:obs_pad + hidden, 0:hidden].set(params["w2"])
    wh = jnp.concatenate([params["wq"], params["wpi"], params["wpo"]], axis=1)
    w_slab = w_slab.at[obs_pad + h_pad:obs_pad + h_pad + hidden, 0:n3].set(wh)

    b_slab = jnp.zeros((3, W), jnp.float32)
    b_slab = b_slab.at[0, 0:hidden].set(params["b1"].reshape(-1))
    b_slab = b_slab.at[1, 0:hidden].set(params["b2"].reshape(-1))
    bh = jnp.concatenate([params["bq"].reshape(-1),
                          params["bpi"].reshape(-1),
                          params["bpo"].reshape(-1)])
    b_slab = b_slab.at[2, 0:n3].set(bh)
    return w_slab, b_slab


# ----------------------------------------------------------------------------
# Forward wrapper
# ----------------------------------------------------------------------------
def make_r_critic_forward(obs_dim, hidden, num_options, max_tile_b=512):
    obs_pad = _round_up(obs_dim, 8)
    h_pad = _round_up(hidden, 8)
    n3 = 3 * num_options
    W = max(hidden, n3)
    rows = obs_pad + 2 * h_pad
    kernel = _make_kernel(obs_pad, hidden, num_options)

    @jax.jit
    def forward(cent_obs, option, w_slab, b_slab):
        B = cent_obs.shape[0]
        tb = min(max_tile_b, _round_up(B, 8))
        b_pad = _round_up(B, tb)

        # Fold dtype-cast / reshape / padding into one input-packing step.
        obs = jnp.zeros((b_pad, obs_pad), jnp.float32)
        obs = obs.at[:B, :obs_dim].set(cent_obs.astype(jnp.float32))
        opt = jnp.zeros((b_pad, 1), jnp.int32)
        opt = opt.at[:B, 0].set(option.reshape(-1).astype(jnp.int32))

        flops = 2 * b_pad * (obs_pad * hidden + hidden * hidden + hidden * n3)
        transc = b_pad * (2 * hidden + 2 * n3)
        bytes_acc = 4 * (b_pad * obs_pad + b_pad + rows * W + 3 * W + b_pad * 3)

        out = pl.pallas_call(
            kernel,
            out_shape=jax.ShapeDtypeStruct((b_pad, 3), jnp.float32),
            grid=(b_pad // tb,),
            in_specs=[
                pl.BlockSpec((tb, obs_pad), lambda i: (i, 0)),   # obs tile (pipelined)
                pl.BlockSpec((tb, 1), lambda i: (i, 0)),         # option tile
                pl.BlockSpec((rows, W), lambda i: (0, 0)),       # resident weight slab
                pl.BlockSpec((3, W), lambda i: (0, 0)),          # resident bias slab
            ],
            out_specs=pl.BlockSpec((tb, 3), lambda i: (i, 0)),   # lane-packed output
            compiler_params=pltpu.CompilerParams(
                dimension_semantics=("parallel",)),
            cost_estimate=pl.CostEstimate(
                flops=flops, transcendentals=transc, bytes_accessed=bytes_acc),
        )(obs, opt, w_slab, b_slab)

        adv = out[:B]
        terminal_adv = adv[:, 0:1]
        option_adv = adv[:, 1:2]
        option_adv_old = adv[:, 2:3]
        return terminal_adv, option_adv, option_adv_old

    return forward


# ----------------------------------------------------------------------------
# Demo
# ----------------------------------------------------------------------------
if __name__ == "__main__":
    key = jax.random.PRNGKey(0)
    k_obs, k_opt, k_par = jax.random.split(key, 3)

    B = 8            # batch (threads * agents)
    OBS_DIM = 32     # flatdim(cent_obs_space)
    HIDDEN = 32      # args.critic_hidden_size
    NUM_OPTIONS = 2  # self.num = 2

    cent_obs = jax.random.normal(k_obs, (B, OBS_DIM), jnp.float32)
    option = jax.random.randint(k_opt, (B,), 0, NUM_OPTIONS, jnp.int32)

    params = init_r_critic_params(k_par, OBS_DIM, HIDDEN, NUM_OPTIONS)
    w_slab, b_slab = pack_r_critic_params(params, OBS_DIM, HIDDEN, NUM_OPTIONS)

    forward = make_r_critic_forward(OBS_DIM, HIDDEN, NUM_OPTIONS)
    terminal_adv, option_adv, option_adv_old = forward(cent_obs, option, w_slab, b_slab)
    jax.block_until_ready((terminal_adv, option_adv, option_adv_old))

    assert terminal_adv.shape == (B, 1)
    assert option_adv.shape == (B, 1)
    assert option_adv_old.shape == (B, 1)
    assert bool(jnp.all(jnp.isfinite(terminal_adv)))
    assert bool(jnp.all(jnp.isfinite(option_adv)))
    assert bool(jnp.all(jnp.isfinite(option_adv_old)))
    print("KERNEL_OK")
</pallas_src>

<mosaic_0001>
module attributes {stable_mosaic.version = 11 : i64} {
  func.func @kernel(%arg0: i32, %arg1: memref<8x32xf32, #tpu.memory_space<vmem>>, %arg2: memref<8x1xi32, #tpu.memory_space<vmem>>, %arg3: memref<96x32xf32, #tpu.memory_space<vmem>>, %arg4: memref<3x32xf32, #tpu.memory_space<vmem>>, %arg5: memref<8x3xf32, #tpu.memory_space<vmem>>) attributes {dimension_semantics = [#tpu.dimension_semantics<parallel>], iteration_bounds = array<i64: 1>, scalar_prefetch = 0 : i64, scratch_operands = 0 : i64, tpu.core_type = #tpu.core_type<tc>, window_params = [{transform_indices = @transform_0, window_bounds = array<i64: 8, 32>}, {transform_indices = @transform_1, window_bounds = array<i64: 8, 1>}, {pipeline_mode = #tpu.pipeline_mode<synchronous>, transform_indices = @transform_2, window_bounds = array<i64: 96, 32>}, {pipeline_mode = #tpu.pipeline_mode<synchronous>, transform_indices = @transform_3, window_bounds = array<i64: 3, 32>}, {transform_indices = @transform_4, window_bounds = array<i64: 8, 3>}]} {
    %c0 = arith.constant 0 : index
    %c0_0 = arith.constant 0 : index
    %0 = vector.load %arg1[%c0, %c0_0] : memref<8x32xf32, #tpu.memory_space<vmem>>, vector<8x32xf32>
    %c0_1 = arith.constant 0 : index
    %c0_2 = arith.constant 0 : index
    %1 = vector.load %arg3[%c0_1, %c0_2] : memref<96x32xf32, #tpu.memory_space<vmem>>, vector<32x32xf32>
    %c32 = arith.constant 32 : index
    %c0_3 = arith.constant 0 : index
    %2 = vector.load %arg3[%c32, %c0_3] : memref<96x32xf32, #tpu.memory_space<vmem>>, vector<32x32xf32>
    %c64 = arith.constant 64 : index
    %c0_4 = arith.constant 0 : index
    %3 = vector.load %arg3[%c64, %c0_4] : memref<96x32xf32, #tpu.memory_space<vmem>>, vector<32x6xf32>
    %c0_5 = arith.constant 0 : index
    %c0_6 = arith.constant 0 : index
    %4 = vector.load %arg4[%c0_5, %c0_6] : memref<3x32xf32, #tpu.memory_space<vmem>>, vector<1x32xf32>
    %c1 = arith.constant 1 : index
    %c0_7 = arith.constant 0 : index
    %5 = vector.load %arg4[%c1, %c0_7] : memref<3x32xf32, #tpu.memory_space<vmem>>, vector<1x32xf32>
    %c2 = arith.constant 2 : index
    %c0_8 = arith.constant 0 : index
    %6 = vector.load %arg4[%c2, %c0_8] : memref<3x32xf32, #tpu.memory_space<vmem>>, vector<1x6xf32>
    %cst = arith.constant dense<0.000000e+00> : vector<8x32xf32>
    %7 = tpu.matmul %0, %1, %cst {dimension_numbers = #tpu.dot_dimension_numbers<[1], [0], [0], [1], [0, 0, 1, 1], [], []>} : vector<8x32xf32>, vector<32x32xf32>, vector<8x32xf32> -> vector<8x32xf32>
    %8 = vector.broadcast %4 : vector<1x32xf32> to vector<8x32xf32>
    %9 = arith.addf %7, %8 : vector<8x32xf32>
    %10 = math.tanh %9 : vector<8x32xf32>
    %cst_9 = arith.constant dense<0.000000e+00> : vector<8x32xf32>
    %11 = tpu.matmul %10, %2, %cst_9 {dimension_numbers = #tpu.dot_dimension_numbers<[1], [0], [0], [1], [0, 0, 1, 1], [], []>} : vector<8x32xf32>, vector<32x32xf32>, vector<8x32xf32> -> vector<8x32xf32>
    %12 = vector.broadcast %5 : vector<1x32xf32> to vector<8x32xf32>
    %13 = arith.addf %11, %12 : vector<8x32xf32>
    %14 = math.tanh %13 : vector<8x32xf32>
    %cst_10 = arith.constant dense<0.000000e+00> : vector<8x6xf32>
    %15 = tpu.matmul %14, %3, %cst_10 {dimension_numbers = #tpu.dot_dimension_numbers<[1], [0], [0], [1], [0, 0, 1, 1], [], []>} : vector<8x32xf32>, vector<32x6xf32>, vector<8x6xf32> -> vector<8x6xf32>
    %16 = vector.broadcast %6 : vector<1x6xf32> to vector<8x6xf32>
    %17 = arith.addf %15, %16 : vector<8x6xf32>
    %18 = vector.extract_strided_slice %17 {offsets = [0, 0], sizes = [8, 2], strides = [1, 1]} : vector<8x6xf32> to vector<8x2xf32>
    %19 = vector.extract_strided_slice %17 {offsets = [0, 2], sizes = [8, 2], strides = [1, 1]} : vector<8x6xf32> to vector<8x2xf32>
    %20 = vector.extract_strided_slice %17 {offsets = [0, 4], sizes = [8, 2], strides = [1, 1]} : vector<8x6xf32> to vector<8x2xf32>
    %cst_11 = arith.constant dense<0xFF800000> : vector<8xf32>
    %21 = vector.multi_reduction <maximumf>, %19, %cst_11 [1] : vector<8x2xf32> to vector<8xf32>
    %22 = vector.shape_cast %21 : vector<8xf32> to vector<8x1xf32>
    %23 = vector.broadcast %22 : vector<8x1xf32> to vector<8x2xf32>
    %24 = arith.subf %19, %23 : vector<8x2xf32>
    %25 = math.exp %24 : vector<8x2xf32>
    %cst_12 = arith.constant dense<0.000000e+00> : vector<8xf32>
    %26 = vector.multi_reduction <add>, %25, %cst_12 [1] : vector<8x2xf32> to vector<8xf32>
    %27 = vector.shape_cast %26 : vector<8xf32> to vector<8x1xf32>
    %28 = tpu.reciprocal %27 {approx = true} : vector<8x1xf32> -> vector<8x1xf32>
    %29 = vector.broadcast %28 : vector<8x1xf32> to vector<8x2xf32>
    %30 = arith.mulf %25, %29 : vector<8x2xf32>
    %cst_13 = arith.constant dense<0xFF800000> : vector<8xf32>
    %31 = vector.multi_reduction <maximumf>, %20, %cst_13 [1] : vector<8x2xf32> to vector<8xf32>
    %32 = vector.shape_cast %31 : vector<8xf32> to vector<8x1xf32>
    %33 = vector.broadcast %32 : vector<8x1xf32> to vector<8x2xf32>
    %34 = arith.subf %20, %33 : vector<8x2xf32>
    %35 = math.exp %34 : vector<8x2xf32>
    %cst_14 = arith.constant dense<0.000000e+00> : vector<8xf32>
    %36 = vector.multi_reduction <add>, %35, %cst_14 [1] : vector<8x2xf32> to vector<8xf32>
    %37 = vector.shape_cast %36 : vector<8xf32> to vector<8x1xf32>
    %38 = tpu.reciprocal %37 {approx = true} : vector<8x1xf32> -> vector<8x1xf32>
    %39 = vector.broadcast %38 : vector<8x1xf32> to vector<8x2xf32>
    %40 = arith.mulf %35, %39 : vector<8x2xf32>
    %41 = tpu.iota {dimensions = array<i32: 1>} : vector<8x2xi32>
    %c0_15 = arith.constant 0 : index
    %c0_16 = arith.constant 0 : index
    %42 = vector.load %arg2[%c0_15, %c0_16] : memref<8x1xi32, #tpu.memory_space<vmem>>, vector<8x1xi32>
    %43 = vector.broadcast %42 : vector<8x1xi32> to vector<8x2xi32>
    %44 = arith.cmpi eq, %41, %43 : vector<8x2xi32>
    %45 = arith.extui %44 : vector<8x2xi1> to vector<8x2xi32>
    %46 = arith.sitofp %45 : vector<8x2xi32> to vector<8x2xf32>
    %47 = arith.subf %46, %30 : vector<8x2xf32>
    %48 = arith.mulf %18, %47 : vector<8x2xf32>
    %cst_17 = arith.constant dense<0.000000e+00> : vector<8xf32>
    %49 = vector.multi_reduction <add>, %48, %cst_17 [1] : vector<8x2xf32> to vector<8xf32>
    %50 = vector.shape_cast %49 : vector<8xf32> to vector<8x1xf32>
    %51 = arith.subf %46, %40 : vector<8x2xf32>
    %52 = arith.mulf %18, %51 : vector<8x2xf32>
    %cst_18 = arith.constant dense<0.000000e+00> : vector<8xf32>
    %53 = vector.multi_reduction <add>, %52, %cst_18 [1] : vector<8x2xf32> to vector<8xf32>
    %54 = vector.shape_cast %53 : vector<8xf32> to vector<8x1xf32>
    %55 = tpu.iota {dimensions = array<i32: 1>} : vector<8x3xi32>
    %c2_i32 = arith.constant 2 : i32
    %56 = vector.broadcast %c2_i32 : i32 to vector<8x3xi32>
    %57 = arith.cmpi eq, %55, %56 : vector<8x3xi32>
    %58 = vector.shape_cast %54 : vector<8x1xf32> to vector<8x1xf32>
    %59 = vector.broadcast %58 : vector<8x1xf32> to vector<8x3xf32>
    %60 = vector.shape_cast %50 : vector<8x1xf32> to vector<8x1xf32>
    %61 = vector.broadcast %60 : vector<8x1xf32> to vector<8x3xf32>
    %62 = arith.select %57, %59, %61 : vector<8x3xi1>, vector<8x3xf32>
    %c0_19 = arith.constant 0 : index
    %c0_20 = arith.constant 0 : index
    %63 = vector.load %arg5[%c0_19, %c0_20] : memref<8x3xf32, #tpu.memory_space<vmem>>, vector<8x3xf32>
    tpu.vector_store %arg5[%c0_19, %c0_20], %62 {strides = array<i32>} : memref<8x3xf32, #tpu.memory_space<vmem>>, vector<8x3xf32>,
    return
  }
  func.func @transform_0(%arg0: i32) -> (i32, i32) {
    %c0_i32 = arith.constant 0 : i32
    %c0_i32_0 = arith.constant 0 : i32
    return %arg0, %c0_i32 : i32, i32
  }
  func.func @transform_1(%arg0: i32) -> (i32, i32) {
    %c0_i32 = arith.constant 0 : i32
    %c0_i32_0 = arith.constant 0 : i32
    return %arg0, %c0_i32 : i32, i32
  }
  func.func @transform_2(%arg0: i32) -> (i32, i32) {
    %c0_i32 = arith.constant 0 : i32
    %c0_i32_0 = arith.constant 0 : i32
    %c0_i32_1 = arith.constant 0 : i32
    return %c0_i32, %c0_i32_0 : i32, i32
  }
  func.func @transform_3(%arg0: i32) -> (i32, i32) {
    %c0_i32 = arith.constant 0 : i32
    %c0_i32_0 = arith.constant 0 : i32
    %c0_i32_1 = arith.constant 0 : i32
    return %c0_i32, %c0_i32_0 : i32, i32
  }
  func.func @transform_4(%arg0: i32) -> (i32, i32) {
    %c0_i32 = arith.constant 0 : i32
    %c0_i32_0 = arith.constant 0 : i32
    return %arg0, %c0_i32 : i32, i32
  }
}

</mosaic_0001>

<bundles_post_ra>
// kernel: forward.1
= control target key start
LH: loop header
LB: loop body
LE: loop exit
PB: predicated region body
PF: predicated region fallthrough
CT: control target
= control target key end

     0   :  { %v427_v0 = vmov 0.0|0.0   ;;  %vm428_vm0 = vmmov 0   ;;  %v429_v4 = vmov 0.0   ;;  %vm37_vm1 = vcmask 261120   ;;  %s526_s2 = inlined_call_operand.vmem [shape: f32[96,32], index: 2, kind: input, shape index: {}]   ;;  %s527_s0 = inlined_call_operand.vmem [shape: f32[8,32], index: 0, kind: input, shape index: {}]   ;;  %s528_s3 = inlined_call_operand.vmem [shape: f32[3,32], index: 3, kind: input, shape index: {}]   ;;  %s529_s1 = inlined_call_operand.vmem [shape: s32[8,1], index: 1, kind: input, shape index: {}]   ;;  %s530_s4 = inlined_call_operand.vmem [shape: f32[8,3], index: 4, kind: output, shape index: {}]  }
   0x1   :  { %390 = vmatprep.subr.bf16.mxu0 %v427_v0  ;;  %v18_v1 = vld [vmem:[%s526_s2] sm:$0xff]  ;;  %v19_v2 = vld [vmem:[%s526_s2 + $0x8] sm:$0xff]  ;;  %v20_v3 = vld [vmem:[%s526_s2 + $0x10] sm:$0xff]  ;;  %365 = vmatprep.mubr.msk.f32.mxu0 %vm428_vm0, %v429_v4  ;;  %vm267_vm2 = vcmask 31760   ;;  %vm284_vm3 = vcmask 48160   ;;  %v430_v43 = vmov 0   ;;  %v300_v57 = vlaneseq }
   0x2   :  { %v391_v5 = vpack.c.bf16 %v19_v2, %v18_v1  ;;  %v21_v6 = vld [vmem:[%s526_s2 + $0x18] sm:$0xff]  ;;  %396 = vmatprep.subr.bf16.mxu1 %v427_v0  ;;  %376 = vmatprep.mubr.msk.f32.mxu1 %vm428_vm0, %v429_v4  ;;  %v17_v8 = vld [vmem:[%s527_s0] sm:$0xff]  ;;  %v23_v10 = vld [vmem:[%s526_s2 + $0x28] sm:$0xff]  ;;  %vm278_vm4 = vcmask 15360   ;;  %vm329_vm7 = vcmask 23552  }
   0x3   :  { %v394_v7 = vpack.c.bf16 %v21_v6, %v20_v3  ;;  %v22_v9 = vld [vmem:[%s526_s2 + $0x20] sm:$0xff]  ;;  %v24_v11 = vld [vmem:[%s526_s2 + $0x30] sm:$0xff]  ;;  %v25_v13 = vld [vmem:[%s526_s2 + $0x38] sm:$0xff]  ;;  %414 = vset.pattern.permute.xlu0 %v430_v43  ;;  %v301_v58 = vand.u32 127, %v300_v57 }
   0x4   :  { %392 = vmatpush3.bf16.msra.mxu0 %v391_v5  ;;  %v397_v12 = vpack.c.bf16 %v23_v10, %v22_v9  ;;  %v400_v14 = vpack.c.bf16 %v25_v13, %v24_v11  ;;  %v335_v15 = vld [vmem:[%s528_s3] ss:$0 sm:$0xff]  ;;  %v27_v21 = vld [vmem:[%s526_s2 + $0x48] sm:$0xff]  ;;  %v28_v22 = vld [vmem:[%s526_s2 + $0x50] sm:$0xff] }
   0x5   :  { %393 = vmatprep.subr.bf16.mxu0 %v427_v0  ;;  %v26_v20 = vld [vmem:[%s526_s2 + $0x40] sm:$0xff]  ;;  %v29_v24 = vld [vmem:[%s526_s2 + $0x58] sm:$0xff]  ;;  %s431_s2 = smov 126   ;;  %vm327_vm6 = vcmp.eq.s32.totalorder %v301_v58, 2 }
   0x6   :  { %398 = vmatpush3.bf16.msra.mxu1 %v397_v12  ;;  %v403_v23 = vpack.c.bf16 %v27_v21, %v26_v20  ;;  %v406_v25 = vpack.c.bf16 %v29_v24, %v28_v22  ;;  %v337_v26 = vld [vmem:[%s528_s3 + $0x1] ss:$0 sm:$0xff]  ;;  %v339_v31 = vld [vmem:[%s528_s3 + $0x2] ss:$0 sm:$0xff]  ;;  %s432_s3 = smov 124  }
   0x7   :  { %399 = vmatprep.subr.bf16.mxu1 %v427_v0  ;;  %v302_v50 = vld [vmem:[%s529_s1] sm:$0xff] }
   0x8   :  { %395 = vmatpush3.bf16.msra.mxu0 %v394_v7 }
   0x9   :  { %402 = vmatprep.subr.bf16.mxu0 %v427_v0 }
   0xa   :  { %401 = vmatpush3.bf16.msra.mxu1 %v400_v14 }
   0xb   :  { %366 = vmatmul.mubr.msk.f32.vlgmr.msra.gmra.mrb[0].mxu0 %vm37_vm1, %v17_v8 }
   0xc   :  { %387 = vmatprep.mubr.msk.f32.mxu0 %vm428_vm0, %v429_v4  ;;  %404 = vmatpush3.bf16.msra.mxu0 %v403_v23 }
   0xd   :  { %405 = vmatprep.subr.bf16.mxu0 %v427_v0 }
  0x10   :  { %407 = vmatpush3.bf16.msra.mxu0 %v406_v25 }
  0xde   :  { %v107_v16 = vpop.f32.mrb[0].mxu0 }
  0xdf   :  { %v108_v17 = vadd.f32 %v335_v15, %v107_v16  ;;  %v367_v18 = vpop.f32.mrb[1].mxu0 }
  0xe1   :  { %415 = vtanh.f32 %v108_v17 }
  0xeb   :  { %v416_v19 = vpop.eup %415 }
  0xec   :  { %377 = vmatmul.mubr.msk.f32.vlgmr.msra.gmra.mrb[0].mxu1 %vm37_vm1, %v416_v19 }
 0x1bf   :  { %v185_v27 = vpop.f32.mrb[0].mxu1 }
 0x1c0   :  { %v186_v28 = vadd.f32 %v337_v26, %v185_v27  ;;  %v378_v29 = vpop.f32.mrb[1].mxu1 }
 0x1c2   :  { %417 = vtanh.f32 %v186_v28 }
 0x1cc   :  { %v418_v30 = vpop.eup %417 }
 0x1cd   :  { %388 = vmatmul.mubr.msk.f32.vlgmr.msra.gmra.mrb[2].mxu0 %vm37_vm1, %v418_v30 }
 0x2a0   :  { %v263_v32 = vpop.f32.mrb[2].mxu0 }
 0x2a1   :  { %v264_v33 = vadd.f32 %v339_v31, %v263_v32  ;;  %v389_v34 = vpop.f32.mrb[3].mxu0 }
 0x2a3   :  { %v268_v35 = vsel %vm267_vm2, %v264_v33, -inf  ;;  %v285_v36 = vsel %vm284_vm3, %v264_v33, -inf }
 0x2a4   :  { %269 = vmax.xlane.f32.xlu0 %v268_v35 }
 0x2a8   :  { %286 = vmax.xlane.f32.xlu0 %v285_v36 }
 0x331   :  { %v270_v37 = vpop.xlane.xlu0 %269 }
 0x332   :  { %v271_v38 = vsub.f32 %v264_v33, %v270_v37 }
 0x334   :  { %v272_v39 = vmul.f32 1.442695, %v271_v38 }
 0x335   :  { %v287_v40 = vpop.xlane.xlu0 %286 }
 0x336   :  { %419 = vpow2.f32 %v272_v39  ;;  %v288_v41 = vsub.f32 %v264_v33, %v287_v40 }
 0x338   :  { %v289_v42 = vmul.f32 1.442695, %v288_v41 }
 0x33a   :  { %421 = vpow2.f32 %v289_v42 }
 0x340   :  { %v420_v44 = vpop.eup %419 }
 0x341   :  { %275 = vrot.lane.b32.xlu1 %v420_v44, %s431_s2 }
 0x344   :  { %v422_v45 = vpop.eup %421 }
 0x345   :  { %292 = vrot.lane.b32.xlu1 %v422_v45, %s432_s3 }
 0x3b3   :  { %v276_v46 = vpop.permute.xlu1 %275 }
 0x3b4   :  { %v279_v47 = vsel %vm278_vm4, %v276_v46, 0.0 }
 0x3b5   :  { %280 = vadd.xlane.f32.xlu0 %v279_v47 }
 0x3b7   :  { %v293_v48 = vpop.permute.xlu1 %292 }
 0x3b8   :  { %v295_v49 = vsel %vm278_vm4, %v293_v48, 0.0 }
 0x3b9   :  { %296 = vadd.xlane.f32.xlu1 %v295_v49 }
 0x3cb   :  { %304 = vperm.xlu0 %414, %v302_v50  }
 0x442   :  { %v281_v51 = vpop.xlane.xlu0 %280 }
 0x443   :  { %423 = vrcp.f32 %v281_v51 }
 0x446   :  { %v297_v52 = vpop.xlane.xlu1 %296 }
 0x447   :  { %425 = vrcp.f32 %v297_v52 }
 0x44a   :  { %v305_v59 = vpop.permute.xlu0 %304 }
 0x44b   :  { %vm306_vm5 = vcmp.eq.s32.totalorder %v301_v58, %v305_v59 }
 0x44c   :  { %v341_v60 = vsel %vm306_vm5, 1.0, %v429_v4 }
 0x44d   :  { %v424_v53 = vpop.eup %423 }
 0x44e   :  { %v283_v54 = vmul.f32 %v424_v53, %v420_v44 }
 0x450   :  { %310 = vrot.lane.b32.xlu1 %v283_v54, %s431_s2 }
 0x451   :  { %v426_v55 = vpop.eup %425 }
 0x452   :  { %v299_v56 = vmul.f32 %v426_v55, %v422_v45 }
 0x454   :  { %319 = vrot.lane.b32.xlu0 %v299_v56, %s432_s3 }
 0x4c2   :  { %v311_v61 = vpop.permute.xlu1 %310 }
 0x4c3   :  { %v313_v62 = vsub.f32 %v341_v60, %v311_v61 }
 0x4c5   :  { %v314_v63 = vmul.f32 %v313_v62, %v264_v33 }
 0x4c6   :  { %v320_v0 = vpop.permute.xlu0 %319 }
 0x4c7   :  { %v322_v1 = vsub.f32 %v341_v60, %v320_v0  ;;  %v315_v2 = vsel %vm278_vm4, %v314_v63, 0.0 }
 0x4c8   :  { %316 = vadd.xlane.f32.xlu0 %v315_v2 }
 0x4c9   :  { %v323_v3 = vmul.f32 %v322_v1, %v264_v33 }
 0x4cb   :  { %v324_v5 = vsel %vm278_vm4, %v323_v3, 0.0 }
 0x4cc   :  { %325 = vadd.xlane.f32.xlu1 %v324_v5 }
 0x555   :  { %v317_v6 = vpop.xlane.xlu0 %316 }
 0x559   :  { %v326_v7 = vpop.xlane.xlu1 %325 }
 0x55a   :  { %v328_v8 = vsel %vm327_vm6, %v326_v7, %v317_v6 }
 0x55b   :  { %330 = vst.msk [vmem:[%s530_s4] sm:$0xff] %vm329_vm7, %v328_v8 }

</bundles_post_ra>
